<compile_context>
chip_gen: v6e
topology: v6e:2x2x1
jax: 0.10.0
libtpu: 0.0.40
codegen_flags: <defaults>
</compile_context>

<pallas_src>
import jax
import jax.numpy as jnp
from jax.experimental import pallas as pl
from jax.experimental.pallas import tpu as pltpu


IN_FEATURES = 4
OUT_FEATURES = 1

LANE = 128                     # batch (lane) axis granularity
MAX_TN = 128 * 1024            # max batch lanes per grid step
VMEM_LIMIT_BYTES = 32 * 1024 * 1024


def _round_up(x, m):
    return ((x + m - 1) // m) * m


def _cdiv(a, b):
    return (a + b - 1) // b


def _linreg_kernel(params_ref, x_ref, o_ref):
    # params_ref: SMEM (5,) f32 = [w0, w1, w2, w3, b]
    # x_ref:      VMEM (4, TN) f32 — features on sublanes, batch on lanes
    # o_ref:      VMEM (1, TN) f32 — lane-dense output row
    acc = params_ref[4] + params_ref[0] * x_ref[0:1, :]   # bias folded into 1st FMA
    acc = acc + params_ref[1] * x_ref[1:2, :]
    acc = acc + params_ref[2] * x_ref[2:3, :]
    o_ref[...] = acc + params_ref[3] * x_ref[3:4, :]


def _tile_plan(n):
    """Pick (tn, n_pad, grid): padding is at most one extra 128-lane block per
    grid step, and the grid has >=2 steps (v7x megacore) once there is work."""
    n128 = _round_up(max(n, 1), LANE)
    num_blocks = _cdiv(n128, MAX_TN)
    if n128 >= 2 * LANE:          # give v7x's 2 TensorCores something to split
        num_blocks = max(num_blocks, 2)
    tn = _round_up(_cdiv(n128, num_blocks), LANE)
    n_pad = tn * num_blocks
    return tn, n_pad, (num_blocks,)


def _linreg_pallas(x_t, params, tn, n_pad, grid):
    return pl.pallas_call(
        _linreg_kernel,
        out_shape=jax.ShapeDtypeStruct((1, n_pad), jnp.float32),
        grid_spec=pltpu.PrefetchScalarGridSpec(
            num_scalar_prefetch=0,
            grid=grid,
            in_specs=[
                pl.BlockSpec(memory_space=pltpu.MemorySpace.SMEM),
                pl.BlockSpec((IN_FEATURES, tn), lambda i: (0, i)),
            ],
            out_specs=pl.BlockSpec((1, tn), lambda i: (0, i)),
        ),
        compiler_params=pltpu.CompilerParams(
            dimension_semantics=("parallel",),
            vmem_limit_bytes=VMEM_LIMIT_BYTES),
        cost_estimate=pl.CostEstimate(
            flops=2 * IN_FEATURES * n_pad,
            transcendentals=0,
            bytes_accessed=(IN_FEATURES * n_pad + n_pad + 8) * 4,
        ),
    )(params, x_t)


@jax.jit
def linear_regression_forward_feature_major(x_t, weight, bias):
    """Fast path. x_t: (4, N) f32 feature-major; weight: (1, 4); bias: (1,).

    Returns (N,) f32 == (x_t.T @ weight.T + bias)[:, 0]. No wrapper transpose,
    no (N, 1) reshape epilogue.
    """
    n = x_t.shape[1]
    tn, n_pad, grid = _tile_plan(n)

    params = jnp.concatenate(
        [weight.astype(jnp.float32).reshape(-1),
         bias.astype(jnp.float32).reshape(-1)])  # (5,) in SMEM

    x_t = x_t.astype(jnp.float32)
    if n_pad != n:
        x_t = jnp.pad(x_t, ((0, 0), (0, n_pad - n)))  # pad tail lanes only

    out_t = _linreg_pallas(x_t, params, tn, n_pad, grid)   # (1, n_pad)
    out = out_t[0]
    return out if n_pad == n else out[:n]


@jax.jit
def linear_regression_forward(x, weight, bias):
    """Torch-compatible adapter matching nn.Linear(4,1): x (N,4) -> (N,1).

    The transpose / (N,1) reshape here are layout-conversion passes outside the
    kernel; producers that can store x feature-major should call
    linear_regression_forward_feature_major directly.
    """
    out = linear_regression_forward_feature_major(
        x.astype(jnp.float32).T, weight, bias)
    return out.reshape(x.shape[0], OUT_FEATURES)


def init_params(key):
    """Deterministic init mimicking torch.nn.Linear(4, 1) default init."""
    k_w, k_b = jax.random.split(key)
    bound = 1.0 / jnp.sqrt(jnp.float32(IN_FEATURES))
    weight = jax.random.uniform(
        k_w, (OUT_FEATURES, IN_FEATURES), jnp.float32, -bound, bound)
    bias = jax.random.uniform(
        k_b, (OUT_FEATURES,), jnp.float32, -bound, bound)
    return weight, bias


if __name__ == "__main__":
    key = jax.random.PRNGKey(0)
    k_x1, k_x2, k_params = jax.random.split(key, 3)
    weight, bias = init_params(k_params)

    # 1) Torch-layout path: small batch of executor feature vectors
    #    [TR, IN, CPU_TOPS, GPU_TOPS] -> predicted wait time.
    batch = 8
    x = jax.random.uniform(k_x1, (batch, IN_FEATURES), jnp.float32, 0.0, 10.0)
    out = jax.block_until_ready(linear_regression_forward(x, weight, bias))
    ref = x @ weight.T + bias
    assert out.shape == (batch, OUT_FEATURES)
    assert jnp.allclose(out, ref, atol=1e-5, rtol=1e-5)

    # 2) Feature-major fast path: ragged batch that exercises a 2-step grid
    #    (tail lanes padded in-kernel, sliced off on return).
    n2 = 300
    x2_t = jax.random.uniform(k_x2, (IN_FEATURES, n2), jnp.float32, 0.0, 10.0)
    out2 = jax.block_until_ready(
        linear_regression_forward_feature_major(x2_t, weight, bias))
    ref2 = (weight.astype(jnp.float32) @ x2_t + bias[:, None])[0]
    assert out2.shape == (n2,)
    assert jnp.allclose(out2, ref2, atol=1e-5, rtol=1e-5)

    print("KERNEL_OK")
</pallas_src>

<mosaic_0001>
module attributes {stable_mosaic.version = 11 : i64} {
  func.func @_linreg_kernel(%arg0: i32, %arg1: memref<5xf32, #tpu.memory_space<smem>>, %arg2: memref<4x128xf32, #tpu.memory_space<vmem>>, %arg3: memref<1x128xf32, #tpu.memory_space<vmem>>) attributes {dimension_semantics = [#tpu.dimension_semantics<parallel>], iteration_bounds = array<i64: 1>, scalar_prefetch = 0 : i64, scratch_operands = 0 : i64, tpu.core_type = #tpu.core_type<tc>, window_params = [{transform_indices = @transform_0, window_bounds = array<i64: 5>}, {transform_indices = @transform_1, window_bounds = array<i64: 4, 128>}, {transform_indices = @transform_2, window_bounds = array<i64: 1, 128>}]} {
    %c4 = arith.constant 4 : index
    %0 = memref.load %arg1[%c4] : memref<5xf32, #tpu.memory_space<smem>>
    %c0 = arith.constant 0 : index
    %1 = memref.load %arg1[%c0] : memref<5xf32, #tpu.memory_space<smem>>
    %c0_0 = arith.constant 0 : index
    %c0_1 = arith.constant 0 : index
    %2 = vector.load %arg2[%c0_0, %c0_1] : memref<4x128xf32, #tpu.memory_space<vmem>>, vector<1x128xf32>
    %3 = vector.broadcast %1 : f32 to vector<1x128xf32>
    %4 = arith.mulf %3, %2 : vector<1x128xf32>
    %5 = vector.broadcast %0 : f32 to vector<1x128xf32>
    %6 = arith.addf %5, %4 : vector<1x128xf32>
    %c1 = arith.constant 1 : index
    %7 = memref.load %arg1[%c1] : memref<5xf32, #tpu.memory_space<smem>>
    %c1_2 = arith.constant 1 : index
    %c0_3 = arith.constant 0 : index
    %8 = vector.load %arg2[%c1_2, %c0_3] : memref<4x128xf32, #tpu.memory_space<vmem>>, vector<1x128xf32>
    %9 = vector.broadcast %7 : f32 to vector<1x128xf32>
    %10 = arith.mulf %9, %8 : vector<1x128xf32>
    %11 = arith.addf %6, %10 : vector<1x128xf32>
    %c2 = arith.constant 2 : index
    %12 = memref.load %arg1[%c2] : memref<5xf32, #tpu.memory_space<smem>>
    %c2_4 = arith.constant 2 : index
    %c0_5 = arith.constant 0 : index
    %13 = vector.load %arg2[%c2_4, %c0_5] : memref<4x128xf32, #tpu.memory_space<vmem>>, vector<1x128xf32>
    %14 = vector.broadcast %12 : f32 to vector<1x128xf32>
    %15 = arith.mulf %14, %13 : vector<1x128xf32>
    %16 = arith.addf %11, %15 : vector<1x128xf32>
    %c3 = arith.constant 3 : index
    %17 = memref.load %arg1[%c3] : memref<5xf32, #tpu.memory_space<smem>>
    %c3_6 = arith.constant 3 : index
    %c0_7 = arith.constant 0 : index
    %18 = vector.load %arg2[%c3_6, %c0_7] : memref<4x128xf32, #tpu.memory_space<vmem>>, vector<1x128xf32>
    %19 = vector.broadcast %17 : f32 to vector<1x128xf32>
    %20 = arith.mulf %19, %18 : vector<1x128xf32>
    %21 = arith.addf %16, %20 : vector<1x128xf32>
    %c0_8 = arith.constant 0 : index
    %c0_9 = arith.constant 0 : index
    %22 = vector.load %arg3[%c0_8, %c0_9] : memref<1x128xf32, #tpu.memory_space<vmem>>, vector<1x128xf32>
    tpu.vector_store %arg3[%c0_8, %c0_9], %21 {strides = array<i32>} : memref<1x128xf32, #tpu.memory_space<vmem>>, vector<1x128xf32>,
    return
  }
  func.func @transform_0(%arg0: i32) -> i32 {
    %c0_i32 = arith.constant 0 : i32
    %c0_i32_0 = arith.constant 0 : i32
    return %c0_i32 : i32
  }
  func.func @transform_1(%arg0: i32) -> (i32, i32) {
    %c0_i32 = arith.constant 0 : i32
    %c0_i32_0 = arith.constant 0 : i32
    return %c0_i32, %arg0 : i32, i32
  }
  func.func @transform_2(%arg0: i32) -> (i32, i32) {
    %c0_i32 = arith.constant 0 : i32
    %c0_i32_0 = arith.constant 0 : i32
    return %c0_i32, %arg0 : i32, i32
  }
}

</mosaic_0001>

<bundles_post_ra>
// kernel: linear_regression_forward_feature_major.1
= control target key start
LH: loop header
LB: loop body
LE: loop exit
PB: predicated region body
PF: predicated region fallthrough
CT: control target
= control target key end

     0   :  { %7 = vsyncpa [#allocation3], 0  ;;  %s105_s0 = inlined_call_operand.vmem [shape: f32[5], index: 0, kind: input, shape index: {}]   ;;  %s106_s1 = inlined_call_operand.vmem [shape: f32[4,128], index: 1, kind: input, shape index: {}]   ;;  %s107_s2 = inlined_call_operand.vmem [shape: f32[1,128], index: 2, kind: output, shape index: {}]  }
   0x1   :  { %s14_s11 = sshll.u32 %s105_s0, 4  ;;  %s15_s11 = int_to_ptr.vmem [resolvable:$true] %s14_s11 }
   0x2   :  { %s57_s12 = scalar_lea.vmem %s15_s11, 16  ;;  %p62_p1 = scmp.lt.s32.totalorder %s15_s11, %s15_s11 }
   0x3   :  { %p58_p0 = scmp.ne.s32.totalorder %s15_s11, %s57_s12  ;;  %p63_p2 = scmp.lt.s32.totalorder %s57_s12, %s57_s12 }
   0x5   :  { %p64_p3 = por %p63_p2, %p62_p1 }
   0x7   :  { %p65_p4 = pnand %p64_p3, %p58_p0 }
   0x9   :  { %68 = shalt.err (!%p65_p4)
}
   0xa   :  { %s71_s13 = smov [#allocation2]  }
   0xb   :  { %17 = dma.vmem_to_smem %s15_s11, 16, %s71_s13, [#allocation3]  }
   0xc   :  { %69 = dma.done.wait [#allocation3], 16  }
   0xd   :  { %70 = vsyncadd [#allocation3], 4294967280 }
   0xe   :  { %23 = sfence }
   0xf   :  { %s52_s14 = sld [smem:[#allocation2 + $0x4]]  ;;  %v26_v0 = vld [vmem:[%s106_s1] sm:$0x1]  ;;  %v32_v1 = vld [vmem:[%s106_s1 + $0x1] sm:$0x1] }
  0x10   :  { %s25_s15 = sld [smem:[#allocation2]]  ;;  %v37_v4 = vld [vmem:[%s106_s1 + $0x2] sm:$0x1]  ;;  %v42_v9 = vld [vmem:[%s106_s1 + $0x3] sm:$0x1] }
  0x11   :  { %s53_s16 = sld [smem:[#allocation2 + $0x1]] }
  0x12   :  { %s54_s17 = sld [smem:[#allocation2 + $0x2]] }
  0x13   :  { %s55_s18 = sld [smem:[#allocation2 + $0x3]] }
  0x15   :  { %v29_v3 = vstv %s52_s14 }
  0x16   :  { %v27_v2 = vstv %s25_s15 }
  0x17   :  { %v28_v5 = vmul.f32 %v27_v2, %v26_v0  ;;  %v33_v6 = vstv %s53_s16 }
  0x18   :  { %v34_v7 = vmul.f32 %v33_v6, %v32_v1  ;;  %v38_v8 = vstv %s54_s17 }
  0x19   :  { %v30_v10 = vadd.f32 %v29_v3, %v28_v5  ;;  %v39_v11 = vmul.f32 %v38_v8, %v37_v4  ;;  %v43_v12 = vstv %s55_s18 }
  0x1a   :  { %v44_v14 = vmul.f32 %v43_v12, %v42_v9 }
  0x1b   :  { %v35_v13 = vadd.f32 %v34_v7, %v30_v10 }
  0x1d   :  { %v40_v15 = vadd.f32 %v39_v11, %v35_v13 }
  0x1f   :  { %v45_v16 = vadd.f32 %v44_v14, %v40_v15 }
  0x21   :  { %46 = vst [vmem:[%s107_s2] sm:$0x1] %v45_v16 }
  0x22   :  { %51 = vsyncpa [#allocation3], 1 }

</bundles_post_ra>
